<compile_context>
chip_gen: v7x
topology: tpu7x:2x2x1
jax: 0.10.0
libtpu: 0.0.40
codegen_flags: <defaults>
</compile_context>

<pallas_src>
import functools
import math

import jax
import jax.numpy as jnp
from jax.experimental import pallas as pl
from jax.experimental.pallas import tpu as pltpu


_TARGET_STEP_BYTES = 1 << 20     # aim for ~1 MiB of HBM traffic per grid step
_MAX_TILE_M = 16384              # cap on the lane (spatial) tile
_MAX_G_PER_BLOCK = 32            # cap on images folded per block (unroll bound)
_STACK_BYTES_LIMIT = 8 << 20     # above this per-batch size, skip jnp.stack


def _round_up(x, m):
    return ((x + m - 1) // m) * m


def _cdiv(a, b):
    return -(-a // b)


def _lcm(a, b):
    return a * b // math.gcd(a, b)


def _vmem_block_budget_bytes():
    # Budget for ONE (input-block + output-block); double-buffering doubles it.
    # Kept conservative so the pipeline stays well under the 32 MiB scoped-VMEM
    # default everywhere and v7x's 64 MiB physical VMEM.
    try:
        cap = getattr(pltpu.get_tpu_info(), "vmem_capacity_bytes", 64 << 20)
    except Exception:
        cap = 64 << 20
    return min(cap // 4, 8 << 20)


def _choose_tiles(G, c_in, c_out, M):
    """Pick (images_per_block, spatial_tile) for the (G*C, M) layout."""
    per_col = (c_in + c_out) * 4          # f32 bytes per image per spatial elem
    budget = _vmem_block_budget_bytes()

    # Smallest image-group step keeping both row blocks sublane (x8) aligned.
    g_step = _lcm(_lcm(8, c_in) // c_in, _lcm(8, c_out) // c_out)

    # Spatial (lane) tile: whole axis when it fits, else a big multiple of 128.
    cap_m = max(128, (budget // (g_step * per_col)) // 128 * 128)
    max_m = min(_MAX_TILE_M, cap_m)
    tile_m = M if M <= max_m else max_m   # tile_m == M (full dim) always legal

    # Images per block: reach ~1 MiB per step, bounded by VMEM + unroll caps.
    per_img = per_col * tile_m
    target_g = _round_up(_cdiv(_TARGET_STEP_BYTES, per_img), g_step)
    vmem_g = max(g_step, (budget // per_img) // g_step * g_step)
    g_blk = min(target_g, vmem_g, _round_up(_MAX_G_PER_BLOCK, g_step))
    if g_blk >= G:
        g_blk = G                         # full row axis -> always layout-legal

    # v7x megacore: if the whole problem is one grid step, split the spatial
    # axis so both TensorCores get work (per-lane op -> always group-safe).
    if _cdiv(G, g_blk) * _cdiv(M, tile_m) == 1 and M >= 256:
        tile_m = _round_up(_cdiv(M, 2), 128)

    return g_blk, tile_m


# ----------------------------------------------------------------------------
# Kernel: for each image group g and output channel o,
#   out[g*C_out + o, s] = relu( b[o] + sum_c wt[o, c] * x[g*C_in + c, s] )
# Spatial axis is the lane dimension -> lane-dense loads AND stores.
# ----------------------------------------------------------------------------
def _pw_conv_relu_kernel(x_ref, wt_ref, b_ref, o_ref, *, g_blk, c_in, c_out):
    # x_ref : (g_blk*c_in,  tile_m)   activations, spatial on lanes
    # wt_ref: (c_out, c_in)           transposed 1x1-conv weights
    # b_ref : (c_out, 1)              bias column
    # o_ref : (g_blk*c_out, tile_m)
    x = x_ref[...]
    wt = wt_ref[...]
    tile_m = x.shape[-1]

    # Hoisted bias broadcast (JAX does not CSE broadcast_in_dim inside loops);
    # the accumulator starts from it, saving a zeros pass and a separate add.
    bias = jnp.broadcast_to(b_ref[...], (c_out, tile_m))

    for g in range(g_blk):                       # static unroll over images
        acc = bias
        for c in range(c_in):                    # static unroll over C_in (VPU)
            r = g * c_in + c
            acc = acc + x[r:r + 1, :] * wt[:, c:c + 1]
        o_ref[g * c_out:(g + 1) * c_out, :] = jnp.maximum(acc, 0.0).astype(
            o_ref.dtype)


# ----------------------------------------------------------------------------
# Fused forward: x has shape (..., C_in, H, W); leading dims may include the
# stacked list-batch axis.  Pure reshapes only (no transposes, no padding).
# ----------------------------------------------------------------------------
@jax.jit
def _fused_forward(x, w, b):
    *lead, c_in, H, W = x.shape
    c_out = w.shape[1]
    M = H * W
    G = 1
    for d in lead:
        G *= d

    x2 = x.reshape(G * c_in, M)                  # layout-preserving reshape
    g_blk, tile_m = _choose_tiles(G, c_in, c_out, M)
    grid = (pl.cdiv(G, g_blk), pl.cdiv(M, tile_m))

    kernel = functools.partial(_pw_conv_relu_kernel,
                               g_blk=g_blk, c_in=c_in, c_out=c_out)

    # Partial last blocks (row or lane) are handled by Pallas' masked writes;
    # correctness holds because the op is per-lane and per-image-group, and row
    # blocks are always aligned to image-group boundaries.
    out2 = pl.pallas_call(
        kernel,
        out_shape=jax.ShapeDtypeStruct((G * c_out, M), jnp.float32),
        grid_spec=pl.GridSpec(
            grid=grid,
            in_specs=[
                pl.BlockSpec((g_blk * c_in, tile_m), lambda i, j: (i, j)),
                pl.BlockSpec((c_out, c_in), lambda i, j: (0, 0)),
                pl.BlockSpec((c_out, 1), lambda i, j: (0, 0)),
            ],
            out_specs=pl.BlockSpec((g_blk * c_out, tile_m),
                                   lambda i, j: (i, j)),
        ),
        compiler_params=pltpu.CompilerParams(
            # Both grid axes are fully independent -> shard across TCs (v7x).
            dimension_semantics=("parallel", "parallel")),
    )(x2, w.T, b.reshape(c_out, 1))

    return out2.reshape(*lead, c_out, H, W)


# ----------------------------------------------------------------------------
# _MultiInstanceModel.forward equivalent
# ----------------------------------------------------------------------------
class MultiInstanceModelPallas:
    """Mirrors _MultiInstanceModel: map the wrapped model over a list of
    batches and return the outputs in the original order.

    # TODO(synk): the multiprocessing send_queue/recv_queue + p_num worker
    # processes are host-side dispatch glue with no Pallas equivalent; the
    # dispatch is replaced by shape-grouped fused pallas_call launches.
    """

    def __init__(self, w, b, p_num=2):
        self.w = w
        self.b = b
        self.p_num = p_num  # interface parity only; no effect on numerics

    def forward(self, input_data):
        if not isinstance(input_data, list):
            # TODO(synk): DataLoader inputs (host-side iterators) are not
            # representable on-device; only the list path is implemented.
            raise ValueError(
                "The input should be a DataLoader or a list of input batchs")
        length = len(input_data)
        if length == 0:
            return []

        outputs = [None] * length
        # Group same-shape batches so each group is a single fused launch.
        groups = {}
        for i, x in enumerate(input_data):
            groups.setdefault(tuple(x.shape), []).append(i)

        for shape, idxs in groups.items():
            itemsize = input_data[idxs[0]].dtype.itemsize
            batch_bytes = itemsize
            for d in shape:
                batch_bytes *= d
            if len(idxs) == 1 or batch_bytes >= _STACK_BYTES_LIMIT:
                # Large (or lone) batches: per-batch fused launches.  The big
                # spatial tiles already amortize launch overhead and we avoid
                # the extra full HBM pass a jnp.stack copy would cost.
                for i in idxs:
                    outputs[i] = _fused_forward(input_data[i], self.w, self.b)
            else:
                # Small same-shape batches: stack (cheap) into one launch so
                # the per-step / per-launch overhead is amortized.
                stacked = jnp.stack([input_data[i] for i in idxs], axis=0)
                out = _fused_forward(stacked, self.w, self.b)
                for k, i in enumerate(idxs):
                    outputs[i] = out[k]
        return outputs

    __call__ = forward


if __name__ == "__main__":
    # Small deterministic shapes: 3 batches of NCHW [2, 4, 16, 16].
    N, C_IN, H, W = 2, 4, 16, 16
    C_OUT = 8
    NUM_BATCHES = 3

    key = jax.random.PRNGKey(0)
    key_w, key_b, *key_x = jax.random.split(key, 2 + NUM_BATCHES)

    # Deterministic synthetic parameters for the wrapped 1x1-conv model.
    w = jax.random.normal(key_w, (C_IN, C_OUT), dtype=jnp.float32) * 0.1
    b = jax.random.normal(key_b, (1, C_OUT), dtype=jnp.float32) * 0.1

    batches = [
        jax.random.normal(k, (N, C_IN, H, W), dtype=jnp.float32)
        for k in key_x
    ]

    model = MultiInstanceModelPallas(w, b, p_num=2)
    outputs = model(batches)
    outputs = [jax.block_until_ready(o) for o in outputs]

    # Sanity check against a plain-JAX reference of the wrapped model.
    for x, o in zip(batches, outputs):
        rows = jnp.transpose(x, (0, 2, 3, 1)).reshape(-1, C_IN)
        ref = jnp.maximum(rows @ w + b, 0.0).reshape(N, H, W, C_OUT)
        ref = jnp.transpose(ref, (0, 3, 1, 2))
        assert o.shape == (N, C_OUT, H, W)
        assert jnp.allclose(o, ref, atol=1e-5, rtol=1e-5)

    print("KERNEL_OK")
</pallas_src>

<mosaic_0001>
module attributes {stable_mosaic.version = 11 : i64} {
  func.func @_pw_conv_relu_kernel(%arg0: i32, %arg1: i32, %arg2: memref<24x128xf32, #tpu.memory_space<vmem>>, %arg3: memref<8x4xf32, #tpu.memory_space<vmem>>, %arg4: memref<8x1xf32, #tpu.memory_space<vmem>>, %arg5: memref<48x128xf32, #tpu.memory_space<vmem>>) attributes {dimension_semantics = [#tpu.dimension_semantics<parallel>, #tpu.dimension_semantics<parallel>], iteration_bounds = array<i64: 1, 2>, scalar_prefetch = 0 : i64, scratch_operands = 0 : i64, tpu.core_type = #tpu.core_type<tc>, window_params = [{transform_indices = @transform_0, window_bounds = array<i64: 24, 128>}, {pipeline_mode = #tpu.pipeline_mode<synchronous>, transform_indices = @transform_1, window_bounds = array<i64: 8, 4>}, {pipeline_mode = #tpu.pipeline_mode<synchronous>, transform_indices = @transform_2, window_bounds = array<i64: 8, 1>}, {transform_indices = @transform_3, window_bounds = array<i64: 48, 128>}]} {
    %c0 = arith.constant 0 : index
    %c0_0 = arith.constant 0 : index
    %0 = vector.load %arg2[%c0, %c0_0] : memref<24x128xf32, #tpu.memory_space<vmem>>, vector<24x128xf32>
    %c0_1 = arith.constant 0 : index
    %c0_2 = arith.constant 0 : index
    %1 = vector.load %arg3[%c0_1, %c0_2] : memref<8x4xf32, #tpu.memory_space<vmem>>, vector<8x4xf32>
    %c0_3 = arith.constant 0 : index
    %c0_4 = arith.constant 0 : index
    %2 = vector.load %arg4[%c0_3, %c0_4] : memref<8x1xf32, #tpu.memory_space<vmem>>, vector<8x1xf32>
    %3 = vector.shape_cast %2 : vector<8x1xf32> to vector<8x1xf32>
    %4 = vector.broadcast %3 : vector<8x1xf32> to vector<8x128xf32>
    %5 = vector.extract_strided_slice %0 {offsets = [0, 0], sizes = [1, 128], strides = [1, 1]} : vector<24x128xf32> to vector<1x128xf32>
    %6 = vector.extract_strided_slice %1 {offsets = [0, 0], sizes = [8, 1], strides = [1, 1]} : vector<8x4xf32> to vector<8x1xf32>
    %7 = vector.broadcast %5 : vector<1x128xf32> to vector<8x128xf32>
    %8 = vector.broadcast %6 : vector<8x1xf32> to vector<8x128xf32>
    %9 = arith.mulf %7, %8 : vector<8x128xf32>
    %10 = arith.addf %4, %9 : vector<8x128xf32>
    %11 = vector.extract_strided_slice %0 {offsets = [1, 0], sizes = [1, 128], strides = [1, 1]} : vector<24x128xf32> to vector<1x128xf32>
    %12 = vector.extract_strided_slice %1 {offsets = [0, 1], sizes = [8, 1], strides = [1, 1]} : vector<8x4xf32> to vector<8x1xf32>
    %13 = vector.broadcast %11 : vector<1x128xf32> to vector<8x128xf32>
    %14 = vector.broadcast %12 : vector<8x1xf32> to vector<8x128xf32>
    %15 = arith.mulf %13, %14 : vector<8x128xf32>
    %16 = arith.addf %10, %15 : vector<8x128xf32>
    %17 = vector.extract_strided_slice %0 {offsets = [2, 0], sizes = [1, 128], strides = [1, 1]} : vector<24x128xf32> to vector<1x128xf32>
    %18 = vector.extract_strided_slice %1 {offsets = [0, 2], sizes = [8, 1], strides = [1, 1]} : vector<8x4xf32> to vector<8x1xf32>
    %19 = vector.broadcast %17 : vector<1x128xf32> to vector<8x128xf32>
    %20 = vector.broadcast %18 : vector<8x1xf32> to vector<8x128xf32>
    %21 = arith.mulf %19, %20 : vector<8x128xf32>
    %22 = arith.addf %16, %21 : vector<8x128xf32>
    %23 = vector.extract_strided_slice %0 {offsets = [3, 0], sizes = [1, 128], strides = [1, 1]} : vector<24x128xf32> to vector<1x128xf32>
    %24 = vector.extract_strided_slice %1 {offsets = [0, 3], sizes = [8, 1], strides = [1, 1]} : vector<8x4xf32> to vector<8x1xf32>
    %25 = vector.broadcast %23 : vector<1x128xf32> to vector<8x128xf32>
    %26 = vector.broadcast %24 : vector<8x1xf32> to vector<8x128xf32>
    %27 = arith.mulf %25, %26 : vector<8x128xf32>
    %28 = arith.addf %22, %27 : vector<8x128xf32>
    %cst = arith.constant 0.000000e+00 : f32
    %29 = vector.broadcast %cst : f32 to vector<8x128xf32>
    %30 = arith.maximumf %28, %29 : vector<8x128xf32>
    %c0_5 = arith.constant 0 : index
    %c0_6 = arith.constant 0 : index
    %31 = vector.load %arg5[%c0_5, %c0_6] : memref<48x128xf32, #tpu.memory_space<vmem>>, vector<8x128xf32>
    tpu.vector_store %arg5[%c0_5, %c0_6], %30 {strides = array<i32>} : memref<48x128xf32, #tpu.memory_space<vmem>>, vector<8x128xf32>,
    %32 = vector.extract_strided_slice %0 {offsets = [4, 0], sizes = [1, 128], strides = [1, 1]} : vector<24x128xf32> to vector<1x128xf32>
    %33 = vector.extract_strided_slice %1 {offsets = [0, 0], sizes = [8, 1], strides = [1, 1]} : vector<8x4xf32> to vector<8x1xf32>
    %34 = vector.broadcast %32 : vector<1x128xf32> to vector<8x128xf32>
    %35 = vector.broadcast %33 : vector<8x1xf32> to vector<8x128xf32>
    %36 = arith.mulf %34, %35 : vector<8x128xf32>
    %37 = arith.addf %4, %36 : vector<8x128xf32>
    %38 = vector.extract_strided_slice %0 {offsets = [5, 0], sizes = [1, 128], strides = [1, 1]} : vector<24x128xf32> to vector<1x128xf32>
    %39 = vector.extract_strided_slice %1 {offsets = [0, 1], sizes = [8, 1], strides = [1, 1]} : vector<8x4xf32> to vector<8x1xf32>
    %40 = vector.broadcast %38 : vector<1x128xf32> to vector<8x128xf32>
    %41 = vector.broadcast %39 : vector<8x1xf32> to vector<8x128xf32>
    %42 = arith.mulf %40, %41 : vector<8x128xf32>
    %43 = arith.addf %37, %42 : vector<8x128xf32>
    %44 = vector.extract_strided_slice %0 {offsets = [6, 0], sizes = [1, 128], strides = [1, 1]} : vector<24x128xf32> to vector<1x128xf32>
    %45 = vector.extract_strided_slice %1 {offsets = [0, 2], sizes = [8, 1], strides = [1, 1]} : vector<8x4xf32> to vector<8x1xf32>
    %46 = vector.broadcast %44 : vector<1x128xf32> to vector<8x128xf32>
    %47 = vector.broadcast %45 : vector<8x1xf32> to vector<8x128xf32>
    %48 = arith.mulf %46, %47 : vector<8x128xf32>
    %49 = arith.addf %43, %48 : vector<8x128xf32>
    %50 = vector.extract_strided_slice %0 {offsets = [7, 0], sizes = [1, 128], strides = [1, 1]} : vector<24x128xf32> to vector<1x128xf32>
    %51 = vector.extract_strided_slice %1 {offsets = [0, 3], sizes = [8, 1], strides = [1, 1]} : vector<8x4xf32> to vector<8x1xf32>
    %52 = vector.broadcast %50 : vector<1x128xf32> to vector<8x128xf32>
    %53 = vector.broadcast %51 : vector<8x1xf32> to vector<8x128xf32>
    %54 = arith.mulf %52, %53 : vector<8x128xf32>
    %55 = arith.addf %49, %54 : vector<8x128xf32>
    %cst_7 = arith.constant 0.000000e+00 : f32
    %56 = vector.broadcast %cst_7 : f32 to vector<8x128xf32>
    %57 = arith.maximumf %55, %56 : vector<8x128xf32>
    %c8 = arith.constant 8 : index
    %c0_8 = arith.constant 0 : index
    %58 = vector.load %arg5[%c8, %c0_8] : memref<48x128xf32, #tpu.memory_space<vmem>>, vector<8x128xf32>
    tpu.vector_store %arg5[%c8, %c0_8], %57 {strides = array<i32>} : memref<48x128xf32, #tpu.memory_space<vmem>>, vector<8x128xf32>,
    %59 = vector.extract_strided_slice %0 {offsets = [8, 0], sizes = [1, 128], strides = [1, 1]} : vector<24x128xf32> to vector<1x128xf32>
    %60 = vector.extract_strided_slice %1 {offsets = [0, 0], sizes = [8, 1], strides = [1, 1]} : vector<8x4xf32> to vector<8x1xf32>
    %61 = vector.broadcast %59 : vector<1x128xf32> to vector<8x128xf32>
    %62 = vector.broadcast %60 : vector<8x1xf32> to vector<8x128xf32>
    %63 = arith.mulf %61, %62 : vector<8x128xf32>
    %64 = arith.addf %4, %63 : vector<8x128xf32>
    %65 = vector.extract_strided_slice %0 {offsets = [9, 0], sizes = [1, 128], strides = [1, 1]} : vector<24x128xf32> to vector<1x128xf32>
    %66 = vector.extract_strided_slice %1 {offsets = [0, 1], sizes = [8, 1], strides = [1, 1]} : vector<8x4xf32> to vector<8x1xf32>
    %67 = vector.broadcast %65 : vector<1x128xf32> to vector<8x128xf32>
    %68 = vector.broadcast %66 : vector<8x1xf32> to vector<8x128xf32>
    %69 = arith.mulf %67, %68 : vector<8x128xf32>
    %70 = arith.addf %64, %69 : vector<8x128xf32>
    %71 = vector.extract_strided_slice %0 {offsets = [10, 0], sizes = [1, 128], strides = [1, 1]} : vector<24x128xf32> to vector<1x128xf32>
    %72 = vector.extract_strided_slice %1 {offsets = [0, 2], sizes = [8, 1], strides = [1, 1]} : vector<8x4xf32> to vector<8x1xf32>
    %73 = vector.broadcast %71 : vector<1x128xf32> to vector<8x128xf32>
    %74 = vector.broadcast %72 : vector<8x1xf32> to vector<8x128xf32>
    %75 = arith.mulf %73, %74 : vector<8x128xf32>
    %76 = arith.addf %70, %75 : vector<8x128xf32>
    %77 = vector.extract_strided_slice %0 {offsets = [11, 0], sizes = [1, 128], strides = [1, 1]} : vector<24x128xf32> to vector<1x128xf32>
    %78 = vector.extract_strided_slice %1 {offsets = [0, 3], sizes = [8, 1], strides = [1, 1]} : vector<8x4xf32> to vector<8x1xf32>
    %79 = vector.broadcast %77 : vector<1x128xf32> to vector<8x128xf32>
    %80 = vector.broadcast %78 : vector<8x1xf32> to vector<8x128xf32>
    %81 = arith.mulf %79, %80 : vector<8x128xf32>
    %82 = arith.addf %76, %81 : vector<8x128xf32>
    %cst_9 = arith.constant 0.000000e+00 : f32
    %83 = vector.broadcast %cst_9 : f32 to vector<8x128xf32>
    %84 = arith.maximumf %82, %83 : vector<8x128xf32>
    %c16 = arith.constant 16 : index
    %c0_10 = arith.constant 0 : index
    %85 = vector.load %arg5[%c16, %c0_10] : memref<48x128xf32, #tpu.memory_space<vmem>>, vector<8x128xf32>
    tpu.vector_store %arg5[%c16, %c0_10], %84 {strides = array<i32>} : memref<48x128xf32, #tpu.memory_space<vmem>>, vector<8x128xf32>,
    %86 = vector.extract_strided_slice %0 {offsets = [12, 0], sizes = [1, 128], strides = [1, 1]} : vector<24x128xf32> to vector<1x128xf32>
    %87 = vector.extract_strided_slice %1 {offsets = [0, 0], sizes = [8, 1], strides = [1, 1]} : vector<8x4xf32> to vector<8x1xf32>
    %88 = vector.broadcast %86 : vector<1x128xf32> to vector<8x128xf32>
    %89 = vector.broadcast %87 : vector<8x1xf32> to vector<8x128xf32>
    %90 = arith.mulf %88, %89 : vector<8x128xf32>
    %91 = arith.addf %4, %90 : vector<8x128xf32>
    %92 = vector.extract_strided_slice %0 {offsets = [13, 0], sizes = [1, 128], strides = [1, 1]} : vector<24x128xf32> to vector<1x128xf32>
    %93 = vector.extract_strided_slice %1 {offsets = [0, 1], sizes = [8, 1], strides = [1, 1]} : vector<8x4xf32> to vector<8x1xf32>
    %94 = vector.broadcast %92 : vector<1x128xf32> to vector<8x128xf32>
    %95 = vector.broadcast %93 : vector<8x1xf32> to vector<8x128xf32>
    %96 = arith.mulf %94, %95 : vector<8x128xf32>
    %97 = arith.addf %91, %96 : vector<8x128xf32>
    %98 = vector.extract_strided_slice %0 {offsets = [14, 0], sizes = [1, 128], strides = [1, 1]} : vector<24x128xf32> to vector<1x128xf32>
    %99 = vector.extract_strided_slice %1 {offsets = [0, 2], sizes = [8, 1], strides = [1, 1]} : vector<8x4xf32> to vector<8x1xf32>
    %100 = vector.broadcast %98 : vector<1x128xf32> to vector<8x128xf32>
    %101 = vector.broadcast %99 : vector<8x1xf32> to vector<8x128xf32>
    %102 = arith.mulf %100, %101 : vector<8x128xf32>
    %103 = arith.addf %97, %102 : vector<8x128xf32>
    %104 = vector.extract_strided_slice %0 {offsets = [15, 0], sizes = [1, 128], strides = [1, 1]} : vector<24x128xf32> to vector<1x128xf32>
    %105 = vector.extract_strided_slice %1 {offsets = [0, 3], sizes = [8, 1], strides = [1, 1]} : vector<8x4xf32> to vector<8x1xf32>
    %106 = vector.broadcast %104 : vector<1x128xf32> to vector<8x128xf32>
    %107 = vector.broadcast %105 : vector<8x1xf32> to vector<8x128xf32>
    %108 = arith.mulf %106, %107 : vector<8x128xf32>
    %109 = arith.addf %103, %108 : vector<8x128xf32>
    %cst_11 = arith.constant 0.000000e+00 : f32
    %110 = vector.broadcast %cst_11 : f32 to vector<8x128xf32>
    %111 = arith.maximumf %109, %110 : vector<8x128xf32>
    %c24 = arith.constant 24 : index
    %c0_12 = arith.constant 0 : index
    %112 = vector.load %arg5[%c24, %c0_12] : memref<48x128xf32, #tpu.memory_space<vmem>>, vector<8x128xf32>
    tpu.vector_store %arg5[%c24, %c0_12], %111 {strides = array<i32>} : memref<48x128xf32, #tpu.memory_space<vmem>>, vector<8x128xf32>,
    %113 = vector.extract_strided_slice %0 {offsets = [16, 0], sizes = [1, 128], strides = [1, 1]} : vector<24x128xf32> to vector<1x128xf32>
    %114 = vector.extract_strided_slice %1 {offsets = [0, 0], sizes = [8, 1], strides = [1, 1]} : vector<8x4xf32> to vector<8x1xf32>
    %115 = vector.broadcast %113 : vector<1x128xf32> to vector<8x128xf32>
    %116 = vector.broadcast %114 : vector<8x1xf32> to vector<8x128xf32>
    %117 = arith.mulf %115, %116 : vector<8x128xf32>
    %118 = arith.addf %4, %117 : vector<8x128xf32>
    %119 = vector.extract_strided_slice %0 {offsets = [17, 0], sizes = [1, 128], strides = [1, 1]} : vector<24x128xf32> to vector<1x128xf32>
    %120 = vector.extract_strided_slice %1 {offsets = [0, 1], sizes = [8, 1], strides = [1, 1]} : vector<8x4xf32> to vector<8x1xf32>
    %121 = vector.broadcast %119 : vector<1x128xf32> to vector<8x128xf32>
    %122 = vector.broadcast %120 : vector<8x1xf32> to vector<8x128xf32>
    %123 = arith.mulf %121, %122 : vector<8x128xf32>
    %124 = arith.addf %118, %123 : vector<8x128xf32>
    %125 = vector.extract_strided_slice %0 {offsets = [18, 0], sizes = [1, 128], strides = [1, 1]} : vector<24x128xf32> to vector<1x128xf32>
    %126 = vector.extract_strided_slice %1 {offsets = [0, 2], sizes = [8, 1], strides = [1, 1]} : vector<8x4xf32> to vector<8x1xf32>
    %127 = vector.broadcast %125 : vector<1x128xf32> to vector<8x128xf32>
    %128 = vector.broadcast %126 : vector<8x1xf32> to vector<8x128xf32>
    %129 = arith.mulf %127, %128 : vector<8x128xf32>
    %130 = arith.addf %124, %129 : vector<8x128xf32>
    %131 = vector.extract_strided_slice %0 {offsets = [19, 0], sizes = [1, 128], strides = [1, 1]} : vector<24x128xf32> to vector<1x128xf32>
    %132 = vector.extract_strided_slice %1 {offsets = [0, 3], sizes = [8, 1], strides = [1, 1]} : vector<8x4xf32> to vector<8x1xf32>
    %133 = vector.broadcast %131 : vector<1x128xf32> to vector<8x128xf32>
    %134 = vector.broadcast %132 : vector<8x1xf32> to vector<8x128xf32>
    %135 = arith.mulf %133, %134 : vector<8x128xf32>
    %136 = arith.addf %130, %135 : vector<8x128xf32>
    %cst_13 = arith.constant 0.000000e+00 : f32
    %137 = vector.broadcast %cst_13 : f32 to vector<8x128xf32>
    %138 = arith.maximumf %136, %137 : vector<8x128xf32>
    %c32 = arith.constant 32 : index
    %c0_14 = arith.constant 0 : index
    %139 = vector.load %arg5[%c32, %c0_14] : memref<48x128xf32, #tpu.memory_space<vmem>>, vector<8x128xf32>
    tpu.vector_store %arg5[%c32, %c0_14], %138 {strides = array<i32>} : memref<48x128xf32, #tpu.memory_space<vmem>>, vector<8x128xf32>,
    %140 = vector.extract_strided_slice %0 {offsets = [20, 0], sizes = [1, 128], strides = [1, 1]} : vector<24x128xf32> to vector<1x128xf32>
    %141 = vector.extract_strided_slice %1 {offsets = [0, 0], sizes = [8, 1], strides = [1, 1]} : vector<8x4xf32> to vector<8x1xf32>
    %142 = vector.broadcast %140 : vector<1x128xf32> to vector<8x128xf32>
    %143 = vector.broadcast %141 : vector<8x1xf32> to vector<8x128xf32>
    %144 = arith.mulf %142, %143 : vector<8x128xf32>
    %145 = arith.addf %4, %144 : vector<8x128xf32>
    %146 = vector.extract_strided_slice %0 {offsets = [21, 0], sizes = [1, 128], strides = [1, 1]} : vector<24x128xf32> to vector<1x128xf32>
    %147 = vector.extract_strided_slice %1 {offsets = [0, 1], sizes = [8, 1], strides = [1, 1]} : vector<8x4xf32> to vector<8x1xf32>
    %148 = vector.broadcast %146 : vector<1x128xf32> to vector<8x128xf32>
    %149 = vector.broadcast %147 : vector<8x1xf32> to vector<8x128xf32>
    %150 = arith.mulf %148, %149 : vector<8x128xf32>
    %151 = arith.addf %145, %150 : vector<8x128xf32>
    %152 = vector.extract_strided_slice %0 {offsets = [22, 0], sizes = [1, 128], strides = [1, 1]} : vector<24x128xf32> to vector<1x128xf32>
    %153 = vector.extract_strided_slice %1 {offsets = [0, 2], sizes = [8, 1], strides = [1, 1]} : vector<8x4xf32> to vector<8x1xf32>
    %154 = vector.broadcast %152 : vector<1x128xf32> to vector<8x128xf32>
    %155 = vector.broadcast %153 : vector<8x1xf32> to vector<8x128xf32>
    %156 = arith.mulf %154, %155 : vector<8x128xf32>
    %157 = arith.addf %151, %156 : vector<8x128xf32>
    %158 = vector.extract_strided_slice %0 {offsets = [23, 0], sizes = [1, 128], strides = [1, 1]} : vector<24x128xf32> to vector<1x128xf32>
    %159 = vector.extract_strided_slice %1 {offsets = [0, 3], sizes = [8, 1], strides = [1, 1]} : vector<8x4xf32> to vector<8x1xf32>
    %160 = vector.broadcast %158 : vector<1x128xf32> to vector<8x128xf32>
    %161 = vector.broadcast %159 : vector<8x1xf32> to vector<8x128xf32>
    %162 = arith.mulf %160, %161 : vector<8x128xf32>
    %163 = arith.addf %157, %162 : vector<8x128xf32>
    %cst_15 = arith.constant 0.000000e+00 : f32
    %164 = vector.broadcast %cst_15 : f32 to vector<8x128xf32>
    %165 = arith.maximumf %163, %164 : vector<8x128xf32>
    %c40 = arith.constant 40 : index
    %c0_16 = arith.constant 0 : index
    %166 = vector.load %arg5[%c40, %c0_16] : memref<48x128xf32, #tpu.memory_space<vmem>>, vector<8x128xf32>
    tpu.vector_store %arg5[%c40, %c0_16], %165 {strides = array<i32>} : memref<48x128xf32, #tpu.memory_space<vmem>>, vector<8x128xf32>,
    return
  }
  func.func @transform_0(%arg0: i32, %arg1: i32) -> (i32, i32) {
    %c0_i32 = arith.constant 0 : i32
    return %arg0, %arg1 : i32, i32
  }
  func.func @transform_1(%arg0: i32, %arg1: i32) -> (i32, i32) {
    %c0_i32 = arith.constant 0 : i32
    %c0_i32_0 = arith.constant 0 : i32
    %c0_i32_1 = arith.constant 0 : i32
    return %c0_i32, %c0_i32_0 : i32, i32
  }
  func.func @transform_2(%arg0: i32, %arg1: i32) -> (i32, i32) {
    %c0_i32 = arith.constant 0 : i32
    %c0_i32_0 = arith.constant 0 : i32
    %c0_i32_1 = arith.constant 0 : i32
    return %c0_i32, %c0_i32_0 : i32, i32
  }
  func.func @transform_3(%arg0: i32, %arg1: i32) -> (i32, i32) {
    %c0_i32 = arith.constant 0 : i32
    return %arg0, %arg1 : i32, i32
  }
}

</mosaic_0001>

<bundles_post_ra>
// kernel: _fused_forward.1
= control target key start
LH: loop header
LB: loop body
LE: loop exit
PB: predicated region body
PF: predicated region fallthrough
CT: control target
= control target key end

     0   :  { %s668_s12 = smov 0   ;;  %s670_s13 = smov 0   ;;  %s795_s0 = inlined_call_operand.vmem [shape: f32[24,256], index: 0, kind: input, shape index: {}]   ;;  %s796_s1 = inlined_call_operand.vmem [shape: f32[8,4], index: 1, kind: input, shape index: {}]   ;;  %s797_s2 = inlined_call_operand.vmem [shape: f32[8,1], index: 2, kind: input, shape index: {}]   ;;  %s798_s3 = inlined_call_operand.vmem [shape: f32[48,256], index: 3, kind: output, shape index: {}]  }
   0x1   :  { %s672_s14 = smov 0   ;;  %s674_s15 = smov 0  }
   0x2   :  { %s676_s16 = smov 0  }
   0x3 LB: > { %s22_s17 = sadd.s32 1, %s638_s15  ;;  %s544_s18 = sadd.s32 4294967295, %s642_s16   ;;  %s642_s16 = sphi %s676_s16, %s13_s16   ;;  %s638_s15 = sphi %s674_s15, %s803_s15   ;;  %s634_s14 = sphi %s672_s14, %s802_s14   ;;  %s630_s13 = sphi %s670_s13, %s801_s13   ;;  %s626_s12 = sphi %s668_s12, %s800_s12  }
   0x4   : > { %p23_p0 = scmp.ge.s32.totalorder %s22_s17, 2  ;;  %p41_p1 = scmp.ne.s32.totalorder %s630_s13, %s626_s12 }
   0x5   : > { %p42_p2 = scmp.eq.s32.totalorder %s642_s16, 0  ;;  %p115_p4 = scmp.eq.s32.totalorder %s544_s18, 1 }
   0x6   : > { %s805_s17 = smov (%p23_p0, %s22_s17), 0  ;;  %s34_s20 = sadd.s32 1, %s630_s13 }
   0x7   : > { %p43_p3 = por %p42_p2, %p41_p1  ;;  %s30_s19 = ssub.s32 %s638_s15, %s805_s17 }
   0x8   : > { %p32_p5 = scmp.eq.s32.totalorder %s30_s19, 0  ;;  %p703_p6 = por %p115_p4, %p41_p1 }
   0x9   : > { %p547_p7 = scmp.ge.s32.totalorder %s642_s16, 2 }
   0xa   : > { %s708_s22 = scalar_select %p32_p5, %s630_s13, %s34_s20  }
   0xb   : > { %143 = sbr.rel (%p547_p7) target bundleno = 25 (0x19), region = 24 }
  0x12   : > { %146 = sbr.rel (!%p43_p3) target bundleno = 25 (0x19), region = 28  ;;  %s148_s23 = sand.u32 (%p43_p3), 1, %s630_s13  }
  0x13   : > { %s548_s24 = sshll.u32 (%p43_p3), %s638_s15, 3  ;;  %s553_s25 = smul.u32 (%p43_p3), 24, %s148_s23 }
  0x14   : > { %s155_s28 = scalar_lea.vmem (%p43_p3), %s795_s0, %s548_s24 }
  0x15   : > { %v187_v0 = vld [vmem:[%s155_s28] sm:$0xff] (%p43_p3)  ;;  %v189_v1 = vld [vmem:[%s155_s28 + $0x10] sm:$0xff] (%p43_p3)  ;;  %s150_s29 = scalar_lea.vmem (%p43_p3), [#allocation2], %s553_s25 }
  0x16   : > { %v191_v2 = vld [vmem:[%s155_s28 + $0x20] sm:$0xff] (%p43_p3)  ;;  %188 = vst [vmem:[%s150_s29] sm:$0xff] (%p43_p3), %v187_v0  ;;  %190 = vst [vmem:[%s150_s29 + $0x8] sm:$0xff] (%p43_p3), %v189_v1 }
  0x17   : > { %192 = vst [vmem:[%s150_s29 + $0x10] sm:$0xff] (%p43_p3), %v191_v2 }
  0x19 PF: > { %p549_p8 = scmp.ge.s32.totalorder %s642_s16, 1  ;;  %p197_p9 = scmp.lt.s32.totalorder %s642_s16, 3 }
  0x1b   : > { %p198_p10 = pnand %p549_p8, %p197_p9 }
  0x1c   : > { %v231_v3 = vld [vmem:[%s796_s1] sm:$0xff] (!%p198_p10)  ;;  %v644_v4 = vmov (!%p198_p10), 0   ;;  %v645_v5 = vmov (!%p198_p10), 1   ;;  %v646_v7 = vmov (!%p198_p10), 2   ;;  %v647_v8 = vmov (!%p198_p10), 3   ;;  %s204_s7 = sand.u32 (!%p198_p10), 1, %s626_s12  }
  0x1d   : > { %201 = sbr.rel (%p198_p10) target bundleno = 185 (0xb9), region = 66  ;;  %600 = vset.pattern.permute.xlu0 (!%p198_p10), %v644_v4  ;;  %601 = vset.pattern.permute.xlu1 (!%p198_p10), %v645_v5  ;;  %v232_v6 = vld [vmem:[%s797_s2] sm:$0xff] (!%p198_p10)  ;;  %v238_v9 = vlaneseq (!%p198_p10) }
  0x1e   : > { %244 = vperm.xlu0 (!%p198_p10), %600, %v231_v3   ;;  %254 = vperm.xlu1 (!%p198_p10), %601, %v231_v3   ;;  %s554_s8 = smul.u32 (!%p198_p10), 24, %s204_s7 }
  0x1f   : > { %v239_v10 = vshrl.u32 (!%p198_p10), %v238_v9, 7  ;;  %s555_s10 = smul.u32 (!%p198_p10), 48, %s204_s7 }
  0x20   : > { %s206_s9 = scalar_lea.vmem (!%p198_p10), [#allocation2], %s554_s8 }
  0x21   : > { %v240_v11 = vsub.s32 (!%p198_p10), 0, %v239_v10  ;;  %v283_v12 = vsub.s32 (!%p198_p10), 4, %v239_v10  ;;  %v727_v13 = vld [vmem:[%s206_s9] sm:$0xff] (!%p198_p10)  ;;  %v729_v14 = vld [vmem:[%s206_s9 + $0x8] sm:$0xff] (!%p198_p10)  ;;  %v251_v15 = vsub.s32 (!%p198_p10), 1, %v239_v10  ;;  %v289_v16 = vsub.s32 (!%p198_p10), 5, %v239_v10 }
  0x22   : > { %235 = vperm.xlu0 (!%p198_p10), %600, %v232_v6   ;;  %602 = vset.pattern.permute.xlu1 (!%p198_p10), %v646_v7  ;;  %v731_v17 = vld [vmem:[%s206_s9 + $0x10] sm:$0xff] (!%p198_p10)  ;;  %v261_v20 = vsub.s32 (!%p198_p10), 2, %v239_v10  ;;  %v735_v21 = vsub.s32 (!%p198_p10), 6, %v239_v10  ;;  %v739_v24 = vsub.s32 (!%p198_p10), 3, %v239_v10  ;;  %v741_v25 = vsub.s32 (!%p198_p10), 7, %v239_v10  ;;  %s225_s11 = scalar_lea.vmem (!%p198_p10), [#allocation3], %s555_s10 }
  0x23   : > { %264 = vperm.xlu1 (!%p198_p10), %602, %v231_v3   ;;  %v241_v18 = vrot.slane (!%p198_p10), %v727_v13, %v240_v11  ;;  %v284_v19 = vrot.slane (!%p198_p10), %v727_v13, %v283_v12  ;;  %v310_v22 = vrot.slane (!%p198_p10), %v729_v14, %v240_v11  ;;  %v336_v23 = vrot.slane (!%p198_p10), %v729_v14, %v283_v12 }
  0x24   : > { %v362_v26 = vrot.slane %v731_v17, %v240_v11  ;;  %v388_v27 = vrot.slane %v731_v17, %v283_v12  ;;  %v252_v28 = vrot.slane %v727_v13, %v251_v15  ;;  %v290_v29 = vrot.slane %v727_v13, %v289_v16  ;;  %s550_s12 = sshll.u32 (%p703_p6), %s634_s14, 3 }
  0x25   : > { %v316_v30 = vrot.slane %v729_v14, %v251_v15  ;;  %v342_v31 = vrot.slane %v729_v14, %v289_v16  ;;  %v368_v32 = vrot.slane %v731_v17, %v251_v15  ;;  %v394_v33 = vrot.slane %v731_v17, %v289_v16  ;;  %s422_s20 = scalar_lea.vmem (%p703_p6), %s798_s3, %s550_s12 }
  0x26   : > { %603 = vset.pattern.permute.xlu0 %v647_v8  ;;  %v262_v34 = vrot.slane %v727_v13, %v261_v20  ;;  %v296_v35 = vrot.slane %v727_v13, %v735_v21  ;;  %v322_v36 = vrot.slane %v729_v14, %v261_v20  ;;  %v348_v37 = vrot.slane %v729_v14, %v735_v21 }
  0x27   : > { %274 = vperm.xlu0 %603, %v231_v3   ;;  %v374_v40 = vrot.slane %v731_v17, %v261_v20  ;;  %v400_v41 = vrot.slane %v731_v17, %v735_v21  ;;  %v272_v42 = vrot.slane %v727_v13, %v739_v24  ;;  %v302_v43 = vrot.slane %v727_v13, %v741_v25 }
  0x28   : > { %v328_v44 = vrot.slane %v729_v14, %v739_v24  ;;  %v354_v45 = vrot.slane %v729_v14, %v741_v25  ;;  %v380_v46 = vrot.slane %v731_v17, %v739_v24  ;;  %v406_v47 = vrot.slane %v731_v17, %v741_v25 }
  0x9d   : > { %v245_v38 = vpop.permute.xlu0 %244  ;;  %v255_v39 = vpop.permute.xlu1 %254 }
  0x9e   : > { %v247_v48 = vmul.f32 %v245_v38, %v241_v18  ;;  %v285_v49 = vmul.f32 %v284_v19, %v245_v38  ;;  %v311_v50 = vmul.f32 %v310_v22, %v245_v38  ;;  %v337_v51 = vmul.f32 %v336_v23, %v245_v38 }
  0x9f   : > { %v363_v52 = vmul.f32 %v362_v26, %v245_v38  ;;  %v389_v53 = vmul.f32 %v388_v27, %v245_v38  ;;  %v257_v54 = vmul.f32 %v255_v39, %v252_v28  ;;  %v291_v55 = vmul.f32 %v290_v29, %v255_v39 }
  0xa0   : > { %v317_v56 = vmul.f32 %v316_v30, %v255_v39  ;;  %v343_v57 = vmul.f32 %v342_v31, %v255_v39  ;;  %v369_v58 = vmul.f32 %v368_v32, %v255_v39  ;;  %v395_v59 = vmul.f32 %v394_v33, %v255_v39 }
  0xa1   : > { %v236_v60 = vpop.permute.xlu0 %235 }
  0xa2   : > { %v248_v61 = vadd.f32 %v247_v48, %v236_v60  ;;  %v286_v62 = vadd.f32 %v285_v49, %v236_v60  ;;  %v312_v63 = vadd.f32 %v311_v50, %v236_v60  ;;  %v338_v0 = vadd.f32 %v337_v51, %v236_v60  ;;  %v265_v1 = vpop.permute.xlu1 %264 }
  0xa3   : > { %v364_v2 = vadd.f32 %v363_v52, %v236_v60  ;;  %v390_v3 = vadd.f32 %v389_v53, %v236_v60  ;;  %v267_v4 = vmul.f32 %v265_v1, %v262_v34  ;;  %v297_v5 = vmul.f32 %v296_v35, %v265_v1 }
  0xa4   : > { %v258_v6 = vadd.f32 %v257_v54, %v248_v61  ;;  %v292_v7 = vadd.f32 %v291_v55, %v286_v62  ;;  %v318_v8 = vadd.f32 %v317_v56, %v312_v63  ;;  %v323_v9 = vmul.f32 %v322_v36, %v265_v1 }
  0xa5   : > { %v344_v10 = vadd.f32 %v343_v57, %v338_v0  ;;  %v349_v11 = vmul.f32 %v348_v37, %v265_v1  ;;  %v370_v12 = vadd.f32 %v369_v58, %v364_v2  ;;  %v375_v13 = vmul.f32 %v374_v40, %v265_v1 }
  0xa6   : > { %v268_v14 = vadd.f32 %v267_v4, %v258_v6  ;;  %v298_v15 = vadd.f32 %v297_v5, %v292_v7  ;;  %v324_v16 = vadd.f32 %v323_v9, %v318_v8  ;;  %v396_v17 = vadd.f32 %v395_v59, %v390_v3  ;;  %v275_v18 = vpop.permute.xlu0 %274 }
  0xa7   : > { %v350_v19 = vadd.f32 %v349_v11, %v344_v10  ;;  %v376_v20 = vadd.f32 %v375_v13, %v370_v12  ;;  %v401_v21 = vmul.f32 %v400_v41, %v265_v1  ;;  %v277_v22 = vmul.f32 %v275_v18, %v272_v42 }
  0xa8   : > { %v303_v23 = vmul.f32 %v302_v43, %v275_v18  ;;  %v329_v24 = vmul.f32 %v328_v44, %v275_v18  ;;  %v355_v25 = vmul.f32 %v354_v45, %v275_v18  ;;  %v381_v26 = vmul.f32 %v380_v46, %v275_v18 }
  0xa9   : > { %v402_v27 = vadd.f32 %v401_v21, %v396_v17  ;;  %v278_v28 = vadd.f32 %v277_v22, %v268_v14  ;;  %v407_v29 = vmul.f32 %v406_v47, %v275_v18 }
  0xaa   : > { %v304_v30 = vadd.f32 %v303_v23, %v298_v15  ;;  %v330_v31 = vadd.f32 %v329_v24, %v324_v16  ;;  %v356_v32 = vadd.f32 %v355_v25, %v350_v19  ;;  %v382_v33 = vadd.f32 %v381_v26, %v376_v20  ;;  %417 = sbr.rel (!%p703_p6) target bundleno = 185 (0xb9), region = 74 }
  0xab   : > { %v279_v34 = vmax.f32 %v278_v28, 0.0  ;;  %v408_v35 = vadd.f32 %v407_v29, %v402_v27 }
  0xac   : > { %v305_v36 = vmax.f32 %v304_v30, 0.0  ;;  %v331_v37 = vmax.f32 %v330_v31, 0.0  ;;  %v357_v38 = vmax.f32 %v356_v32, 0.0  ;;  %v383_v39 = vmax.f32 %v382_v33, 0.0 }
  0xad   : > { %280 = vst [vmem:[%s225_s11] sm:$0xff] %v279_v34  ;;  %v409_v40 = vmax.f32 %v408_v35, 0.0 }
  0xae   : > { %306 = vst [vmem:[%s225_s11 + $0x8] sm:$0xff] %v305_v36  ;;  %332 = vst [vmem:[%s225_s11 + $0x10] sm:$0xff] %v331_v37 }
  0xaf   : > { %358 = vst [vmem:[%s225_s11 + $0x18] sm:$0xff] %v357_v38  ;;  %384 = vst [vmem:[%s225_s11 + $0x20] sm:$0xff] %v383_v39 }
  0xb0   : > { %410 = vst [vmem:[%s225_s11 + $0x28] sm:$0xff] %v409_v40 }
  0xb4   : > { %v460_v41 = vld [vmem:[%s225_s11] sm:$0xff] }
  0xb5   : > { %v462_v42 = vld [vmem:[%s225_s11 + $0x8] sm:$0xff]  ;;  %v464_v43 = vld [vmem:[%s225_s11 + $0x10] sm:$0xff]  ;;  %461 = vst [vmem:[%s422_s20] sm:$0xff] %v460_v41 }
  0xb6   : > { %v466_v44 = vld [vmem:[%s225_s11 + $0x18] sm:$0xff]  ;;  %v468_v45 = vld [vmem:[%s225_s11 + $0x20] sm:$0xff]  ;;  %463 = vst [vmem:[%s422_s20 + $0x10] sm:$0xff] %v462_v42  ;;  %465 = vst [vmem:[%s422_s20 + $0x20] sm:$0xff] %v464_v43 }
  0xb7   : > { %v470_v46 = vld [vmem:[%s225_s11 + $0x28] sm:$0xff]  ;;  %467 = vst [vmem:[%s422_s20 + $0x30] sm:$0xff] %v466_v44  ;;  %469 = vst [vmem:[%s422_s20 + $0x40] sm:$0xff] %v468_v45 }
  0xb8   : > { %471 = vst [vmem:[%s422_s20 + $0x50] sm:$0xff] %v470_v46 }
  0xb9 PF: > { %s13_s16 = sadd.s32 1, %s642_s16   ;;  %s800_s12 = smov %s630_s13 }
  0xba   : > { %p10_p11 = scmp.ge.s32.totalorder %s13_s16, 4   ;;  %s801_s13 = smov %s708_s22 }
  0xbb   : > { %s802_s14 = smov %s638_s15  ;;  %s803_s15 = smov %s805_s17 }
  0xbc   :  { %12 = sbr.rel (!%p10_p11) target bundleno = 3 (0x3), region = 143 }

</bundles_post_ra>
